<compile_context>
chip_gen: v7x
topology: tpu7x:2x2x1
jax: 0.10.0
libtpu: 0.0.40
codegen_flags: <defaults>
</compile_context>

<pallas_src>
import jax
import jax.numpy as jnp
from jax.experimental import pallas as pl
from jax.experimental.pallas import tpu as pltpu


# Below this output size, jnp.pad beats any custom kernel on launch overhead.
_SMALL_OUTPUT_BYTES = 4 * 1024 * 1024


def _pad_kernel(x_ref, o_ref):
    # x_ref: (TM, data_dim), o_ref: (TM, padded_dim)
    rows, data_dim = x_ref.shape
    padded_dim = o_ref.shape[1]
    # 128-lane aligned split point: the head chunk carries the input data plus
    # at most a <128-lane zero fringe; the tail chunk is pure zeros with a
    # lane-aligned start, stored directly (no full-width concat temp).
    c0 = min(((data_dim + 127) // 128) * 128, padded_dim)
    if c0 == data_dim:
        o_ref[:, :data_dim] = x_ref[...]
    else:
        fringe = jnp.zeros((rows, c0 - data_dim), dtype=o_ref.dtype)
        o_ref[:, :c0] = jnp.concatenate([x_ref[...], fringe], axis=1)
    if c0 < padded_dim:
        o_ref[:, c0:] = jnp.zeros((rows, padded_dim - c0), dtype=o_ref.dtype)


def _choose_tile_rows(n_rows, data_dim, padded_dim, itemsize, min_steps=4):
    """Pick a row tile so (a) double-buffered (in + out) tiles fit a 12 MiB
    budget — safe under every generation's default scoped VMEM limit
    (16/32/32 MiB on v5e/v6e/v7x; v7x has only 64 MiB physical) — and
    (b) large inputs get at least `min_steps` grid steps so the read and
    write DMA streams overlap and v7x's two TensorCores both get work."""
    budget_bytes = 12 * 1024 * 1024
    bytes_per_row = 2 * (data_dim + padded_dim) * itemsize      # 2 = double buffering
    # Sublane granule per dtype: f32 -> 8, bf16 -> 16, int8/fp8 -> 32.
    sub = max(8, 32 // max(int(itemsize), 1))
    tm_vmem = budget_bytes // max(bytes_per_row, 1)
    tm_steps = -(-n_rows // min_steps)                          # cdiv: keep >= min_steps programs
    tm = min(tm_vmem, tm_steps, 2048)
    tm = max(sub, (tm // sub) * sub)
    if tm >= n_rows:
        return n_rows                                           # full-extent block (always legal)
    return tm


def resize_forward(x, n_class, n_support, data_dim, need_dim, *,
                   tile_rows=None, force_pallas=False):
    """JAX/Pallas equivalent of Resize.forward."""
    assert x.shape == (n_class * n_support, data_dim)
    padded_dim = need_dim * need_dim

    if padded_dim <= data_dim:
        # PyTorch branch: return x unchanged (no reshape, no pad).
        return x

    n_rows = x.shape[0]
    itemsize = jnp.dtype(x.dtype).itemsize
    out_bytes = n_rows * padded_dim * itemsize

    # Small-input early-out: custom-call dispatch + pipeline setup (multi-µs)
    # dwarfs the copy for KB-scale inputs; XLA's fused pad is strictly faster.
    if (not force_pallas and tile_rows is None
            and out_bytes < _SMALL_OUTPUT_BYTES):
        padded = jnp.pad(x, ((0, 0), (0, padded_dim - data_dim)))
        return padded.reshape(n_class, n_support, need_dim, need_dim)

    tm = tile_rows if tile_rows is not None else _choose_tile_rows(
        n_rows, data_dim, padded_dim, itemsize)
    tm = min(tm, n_rows)

    # Derive the compiler VMEM limit from the same tile so heuristic and limit
    # never diverge: 2 buffers x (in tile + out tile) + headroom for Pallas'
    # own semaphores/scratch, clamped to values legal on every generation.
    vmem_needed = 2 * tm * (data_dim + padded_dim) * itemsize
    vmem_limit = int(min(max(vmem_needed + (4 << 20), 16 << 20), 48 << 20))

    padded = pl.pallas_call(
        _pad_kernel,
        out_shape=jax.ShapeDtypeStruct((n_rows, padded_dim), x.dtype),
        grid=(pl.cdiv(n_rows, tm),),
        in_specs=[pl.BlockSpec((tm, data_dim), lambda i: (i, 0))],
        out_specs=pl.BlockSpec((tm, padded_dim), lambda i: (i, 0)),
        compiler_params=pltpu.CompilerParams(
            dimension_semantics=("parallel",),
            vmem_limit_bytes=vmem_limit,
        ),
    )(x)

    # Pure metadata reshape (same as torch .view on contiguous memory).
    return padded.reshape(n_class, n_support, need_dim, need_dim)


def _reference(x, n_class, n_support, data_dim, need_dim):
    padded_dim = need_dim * need_dim
    if padded_dim <= data_dim:
        return x
    return jnp.concatenate(
        [x, jnp.zeros((x.shape[0], padded_dim - data_dim), x.dtype)], axis=1
    ).reshape(n_class, n_support, need_dim, need_dim)


if __name__ == "__main__":
    key = jax.random.PRNGKey(0)

    # --- Case 1: small shapes consistent with the module; force the Pallas
    #             kernel so it actually compiles/runs on TPU in this test ---
    n_class, n_support, data_dim, need_dim = 2, 4, 100, 16   # 100 -> 256 cols
    x = jax.random.normal(key, (n_class * n_support, data_dim), dtype=jnp.float32)

    out = jax.block_until_ready(
        resize_forward(x, n_class, n_support, data_dim, need_dim,
                       force_pallas=True))
    ref = _reference(x, n_class, n_support, data_dim, need_dim)
    assert out.shape == (n_class, n_support, need_dim, need_dim)
    assert jnp.allclose(out, ref)

    # --- Case 2: default path for the same small shapes hits the jnp.pad
    #             fallback (perf early-out); result must be identical ---
    out_fb = jax.block_until_ready(
        resize_forward(x, n_class, n_support, data_dim, need_dim))
    assert out_fb.shape == (n_class, n_support, need_dim, need_dim)
    assert jnp.allclose(out_fb, ref)

    # --- Case 3: no-op branch (need_dim*need_dim <= data_dim) ---
    out2 = jax.block_until_ready(resize_forward(x, n_class, n_support, data_dim, 8))
    assert out2.shape == x.shape and jnp.allclose(out2, x)

    # --- Case 4: multi-block grid with a ragged last row tile (Pallas path,
    #             padded_dim % 128 != 0 so tail stores are masked) ---
    n_class3, n_support3, data_dim3, need_dim3 = 3, 7, 200, 20  # 21 rows, 200->400
    x3 = jax.random.normal(jax.random.PRNGKey(0),
                           (n_class3 * n_support3, data_dim3), dtype=jnp.float32)
    out3 = jax.block_until_ready(
        resize_forward(x3, n_class3, n_support3, data_dim3, need_dim3,
                       tile_rows=8))
    ref3 = _reference(x3, n_class3, n_support3, data_dim3, need_dim3)
    assert out3.shape == (n_class3, n_support3, need_dim3, need_dim3)
    assert jnp.allclose(out3, ref3)

    # --- Case 5: bf16 input exercises the dtype-aware sublane rounding ---
    xb = x.astype(jnp.bfloat16)
    outb = jax.block_until_ready(
        resize_forward(xb, n_class, n_support, data_dim, need_dim,
                       force_pallas=True))
    refb = _reference(xb, n_class, n_support, data_dim, need_dim)
    assert outb.dtype == jnp.bfloat16 and jnp.array_equal(outb, refb)

    print("KERNEL_OK")
</pallas_src>

<mosaic_0001>
module attributes {stable_mosaic.version = 11 : i64} {
  func.func @_pad_kernel(%arg0: i32, %arg1: memref<8x100xf32, #tpu.memory_space<vmem>>, %arg2: memref<8x256xf32, #tpu.memory_space<vmem>>) attributes {dimension_semantics = [#tpu.dimension_semantics<parallel>], iteration_bounds = array<i64: 1>, scalar_prefetch = 0 : i64, scratch_operands = 0 : i64, tpu.core_type = #tpu.core_type<tc>, window_params = [{transform_indices = @transform_0, window_bounds = array<i64: 8, 100>}, {transform_indices = @transform_1, window_bounds = array<i64: 8, 256>}]} {
    %cst = arith.constant 0.000000e+00 : f32
    %0 = vector.broadcast %cst : f32 to vector<8x28xf32>
    %c0 = arith.constant 0 : index
    %c0_0 = arith.constant 0 : index
    %1 = vector.load %arg1[%c0, %c0_0] : memref<8x100xf32, #tpu.memory_space<vmem>>, vector<8x100xf32>
    %2 = tpu.concatenate %1, %0 in 1 : vector<8x100xf32>, vector<8x28xf32> -> vector<8x128xf32>
    %c0_1 = arith.constant 0 : index
    %c0_2 = arith.constant 0 : index
    %3 = vector.load %arg2[%c0_1, %c0_2] : memref<8x256xf32, #tpu.memory_space<vmem>>, vector<8x128xf32>
    tpu.vector_store %arg2[%c0_1, %c0_2], %2 {strides = array<i32>} : memref<8x256xf32, #tpu.memory_space<vmem>>, vector<8x128xf32>,
    %cst_3 = arith.constant 0.000000e+00 : f32
    %4 = vector.broadcast %cst_3 : f32 to vector<8x128xf32>
    %c0_4 = arith.constant 0 : index
    %c128 = arith.constant 128 : index
    %5 = vector.load %arg2[%c0_4, %c128] : memref<8x256xf32, #tpu.memory_space<vmem>>, vector<8x128xf32>
    tpu.vector_store %arg2[%c0_4, %c128], %4 {strides = array<i32>} : memref<8x256xf32, #tpu.memory_space<vmem>>, vector<8x128xf32>,
    return
  }
  func.func @transform_0(%arg0: i32) -> (i32, i32) {
    %c0_i32 = arith.constant 0 : i32
    %c0_i32_0 = arith.constant 0 : i32
    return %arg0, %c0_i32 : i32, i32
  }
  func.func @transform_1(%arg0: i32) -> (i32, i32) {
    %c0_i32 = arith.constant 0 : i32
    %c0_i32_0 = arith.constant 0 : i32
    return %arg0, %c0_i32 : i32, i32
  }
}

</mosaic_0001>

<bundles_post_ra>
// kernel: tpu_custom_call.1
= control target key start
LH: loop header
LB: loop body
LE: loop exit
PB: predicated region body
PF: predicated region fallthrough
CT: control target
= control target key end

     0   :  { %6 = vsyncpa [#allocation3], 0  ;;  %s129_s0 = inlined_call_operand.hbm [shape: f32[8,100], index: 0, kind: input, shape index: {}]   ;;  %s130_s1 = inlined_call_operand.hbm [shape: f32[8,256], index: 1, kind: output, shape index: {}]  }
   0x1   :  { %7 = vsyncpa [#allocation4], 0  ;;  %s92_s6 = smov [#allocation2]   ;;  %s44_s10 = scalar_lea.hbm %s129_s0, 128 }
   0x2   :  { %s14_s7 = sshll.u32 %s92_s6, 4  ;;  %p45_p0 = scmp.ne.s32.totalorder %s129_s0, %s44_s10  ;;  %s15_s7 = int_to_ptr.vmem [resolvable:$true] %s14_s7 }
   0x3   :  { %p48_p1 = scmp.lt.u32.totalorder %s44_s10, %s129_s0 }
   0x5   :  { %p50_p2 = pnand %p48_p1, %p45_p0 }
   0x7   :  { %53 = shalt.err (!%p50_p2)
}
   0x8   :  { %s54_s15 = scalar_lea.vmem %s15_s7, 128  ;;  %p59_p4 = scmp.lt.s32.totalorder %s15_s7, %s15_s7 }
   0x9   :  { %p55_p3 = scmp.ne.s32.totalorder %s15_s7, %s54_s15  ;;  %p60_p5 = scmp.lt.s32.totalorder %s54_s15, %s54_s15 }
   0xb   :  { %p61_p6 = por %p60_p5, %p59_p4 }
   0xd   :  { %p62_p7 = pnand %p61_p6, %p55_p3 }
   0xf   :  { %65 = shalt.err (!%p62_p7)
}
  0x10   :  { %17 = dma.hbm_to_vmem [thread:$0]  %s129_s0, 128, %s15_s7, [#allocation3]  }
  0x11   :  { %88 = dma.done.wait [#allocation3], 128  }
  0x12   :  { %89 = vsyncadd [#allocation3], 4294967168  ;;  %v93_v0 = vmov 0.0   ;;  %s94_s18 = smov [#allocation5]   ;;  %vm22_vm0 = vcmask 818176   ;;  %v21_v1 = vld [vmem:[#allocation2] sm:$0xff] }
  0x13   :  { %25 = vst [vmem:[#allocation5 + $0x8] sm:$0xff] %v93_v0  ;;  %s32_s19 = sshll.u32 %s94_s18, 4  ;;  %v23_v2 = vsel %vm22_vm0, %v21_v1, 0.0  ;;  %s33_s19 = int_to_ptr.vmem [resolvable:$true] %s32_s19 }
  0x14   :  { %24 = vst [vmem:[#allocation5] sm:$0xff] %v23_v2  ;;  %s66_s20 = scalar_lea.vmem %s33_s19, 256  ;;  %p71_p9 = scmp.lt.s32.totalorder %s33_s19, %s33_s19 }
  0x15   :  { %p67_p8 = scmp.ne.s32.totalorder %s33_s19, %s66_s20  ;;  %p72_p10 = scmp.lt.s32.totalorder %s66_s20, %s66_s20 }
  0x17   :  { %p73_p11 = por %p72_p10, %p71_p9 }
  0x19   :  { %p74_p12 = pnand %p73_p11, %p67_p8 }
  0x1b   :  { %77 = shalt.err (!%p74_p12)
}
  0x1c   :  { %s78_s22 = scalar_lea.hbm %s130_s1, 256 }
  0x1d   :  { %p79_p13 = scmp.ne.s32.totalorder %s130_s1, %s78_s22  ;;  %p82_p0 = scmp.lt.u32.totalorder %s78_s22, %s130_s1 }
  0x1f   :  { %p84_p1 = pnand %p82_p0, %p79_p13 }
  0x21   :  { %87 = shalt.err (!%p84_p1)
}
  0x22   :  { %35 = dma.vmem_to_hbm [thread:$0]  %s33_s19, 256, %s130_s1, [#allocation4]  }
  0x23   :  { %90 = dma.done.wait [#allocation4], 256  }
  0x24   :  { %91 = vsyncadd [#allocation4], 4294967040 }
  0x25   :  { %39 = vsyncpa [#allocation3], 1 }
  0x26   :  { %40 = vsyncpa [#allocation4], 1 }

</bundles_post_ra>
